<compile_context>
chip_gen: v7x
topology: tpu7x:2x2x1
jax: 0.10.0
libtpu: 0.0.40
codegen_flags: <defaults>
</compile_context>

<pallas_src>
import math
import jax
import jax.numpy as jnp
from jax.experimental import pallas as pl
from jax.experimental.pallas import tpu as pltpu

LANE = 128     # TPU lane width (used only to pad the last-layer weight in VMEM)
SUBLANE = 16   # bf16 rows per sublane-group; batch tiles are multiples of this


def _round_up(n, m):
    return ((n + m - 1) // m) * m


def _cdiv(a, b):
    return (a + b - 1) // b


def _choose_batch_tile(B, tm_max):
    """Pick a batch tile that (a) is a multiple of 16 (bf16 packing),
    (b) gives the grid >=4 steps when the batch allows (v7x megacore split),
    and (c) keeps the padded fraction small at awkward batch sizes."""
    tm_max = max(SUBLANE, _round_up(tm_max, SUBLANE))
    # Cap so large batches get at least ~4 grid steps.
    tm_cap = min(tm_max, max(SUBLANE, _round_up(_cdiv(B, 4), SUBLANE)))
    n_steps = max(1, _cdiv(B, tm_cap))
    # Re-size the tile to the chosen step count so padding is minimal.
    return _round_up(_cdiv(B, n_steps), SUBLANE)


def mlp_kernel(x_ref, w1_ref, b1_ref, w2_ref, b2_ref,
               w3_ref, b3_ref, w4_ref, b4_ref, o_ref):
    # bf16 operands on the MXU, f32 accumulation; bias + ReLU in f32,
    # single cast back to bf16 between layers.
    h = jnp.dot(x_ref[...], w1_ref[...],
                preferred_element_type=jnp.float32) + b1_ref[...]
    h = jnp.maximum(h, 0.0).astype(jnp.bfloat16)

    h = jnp.dot(h, w2_ref[...],
                preferred_element_type=jnp.float32) + b2_ref[...]
    h = jnp.maximum(h, 0.0).astype(jnp.bfloat16)

    h = jnp.dot(h, w3_ref[...],
                preferred_element_type=jnp.float32) + b3_ref[...]
    h = jnp.maximum(h, 0.0).astype(jnp.bfloat16)

    # Final layer: w4 is zero-padded to 128 lanes for a clean MXU feed, but
    # only the first out_f columns are bias-added and stored (narrow f32 vst;
    # no 128-lane padded writeback to HBM).
    out_f = o_ref.shape[1]
    acc = jnp.dot(h, w4_ref[...], preferred_element_type=jnp.float32)
    o_ref[...] = (acc[:, :out_f] + b4_ref[...]).astype(o_ref.dtype)


def ann_model_forward(x, params, *, tm=2048):
    """x: [B, 8] float32; params: dict of f32 weights/biases. Returns [B, 2] f32."""
    w1, b1 = params["w1"], params["b1"]
    w2, b2 = params["w2"], params["b2"]
    w3, b3 = params["w3"], params["b3"]
    w4, b4 = params["w4"], params["b4"]

    B, in_f = x.shape
    h1, h2, h3 = w1.shape[1], w2.shape[1], w3.shape[1]
    out_f = w4.shape[1]
    n_pad = _round_up(out_f, LANE)  # MXU-facing width of the last layer (VMEM only)

    # Pad the last-layer weight to 128 lanes with zeros (never written to HBM
    # as output; only the first out_f accumulator columns are stored).
    w4p = jnp.zeros((w4.shape[0], n_pad), jnp.float32).at[:, :out_f].set(w4)

    # Cast MXU operands to bf16 once, outside the grid loop. Biases stay f32.
    xb = x.astype(jnp.bfloat16)
    w1b = w1.astype(jnp.bfloat16)
    w2b = w2.astype(jnp.bfloat16)
    w3b = w3.astype(jnp.bfloat16)
    w4b = w4p.astype(jnp.bfloat16)

    tm_eff = _choose_batch_tile(B, tm)
    b_pad = _round_up(B, tm_eff)
    if b_pad != B:
        xb = jnp.pad(xb, ((0, b_pad - B), (0, 0)))
    grid = (b_pad // tm_eff,)

    flops = 2 * b_pad * (in_f * h1 + h1 * h2 + h2 * h3 + h3 * n_pad)
    bytes_accessed = (
        xb.size * 2                      # bf16 input read
        + b_pad * out_f * 4              # narrow f32 output write
        + (w1b.size + w2b.size + w3b.size + w4b.size) * 2
        + (b1.size + b2.size + b3.size + b4.size) * 4
    )

    def const(i):        # weights/biases: same block every grid step (VMEM-resident)
        return (0, 0)

    def batch_map(i):    # x / out: walk the batch dimension
        return (i, 0)

    out = pl.pallas_call(
        mlp_kernel,
        out_shape=jax.ShapeDtypeStruct((b_pad, out_f), jnp.float32),
        grid=grid,
        in_specs=[
            pl.BlockSpec((tm_eff, in_f), batch_map),
            pl.BlockSpec(w1b.shape, const), pl.BlockSpec(b1.shape, const),
            pl.BlockSpec(w2b.shape, const), pl.BlockSpec(b2.shape, const),
            pl.BlockSpec(w3b.shape, const), pl.BlockSpec(b3.shape, const),
            pl.BlockSpec(w4b.shape, const), pl.BlockSpec(b4.shape, const),
        ],
        out_specs=pl.BlockSpec((tm_eff, out_f), batch_map),
        compiler_params=pltpu.CompilerParams(
            dimension_semantics=("parallel",),       # megacore split on v7x
            vmem_limit_bytes=32 * 1024 * 1024,
        ),
        cost_estimate=pl.CostEstimate(
            flops=flops, transcendentals=0, bytes_accessed=bytes_accessed),
    )(xb, w1b, b1, w2b, b2, w3b, b3, w4b, b4)

    if b_pad != B:
        out = out[:B]    # row slice only; no column slice needed anymore
    return out


# ----------------------------------------------------------------------------
# Parameter init (mimics PyTorch nn.Linear default U[-1/sqrt(fan_in), 1/sqrt(fan_in)])
# ----------------------------------------------------------------------------
def init_linear(key, fan_in, fan_out):
    kw, kb = jax.random.split(key)
    bound = 1.0 / math.sqrt(fan_in)
    w = jax.random.uniform(kw, (fan_in, fan_out), jnp.float32, -bound, bound)
    b = jax.random.uniform(kb, (1, fan_out), jnp.float32, -bound, bound)
    return w, b


def make_params(key, input_features=8, hidden1=256, hidden2=64, hidden3=64,
                out_features=2):
    k1, k2, k3, k4 = jax.random.split(key, 4)
    w1, b1 = init_linear(k1, input_features, hidden1)
    w2, b2 = init_linear(k2, hidden1, hidden2)
    w3, b3 = init_linear(k3, hidden2, hidden3)
    # Matches the PyTorch module: self.out = nn.Linear(hidden2, out_features)
    w4, b4 = init_linear(k4, hidden2, out_features)
    return dict(w1=w1, b1=b1, w2=w2, b2=b2, w3=w3, b3=b3, w4=w4, b4=b4)


def reference_forward_f32(x, p):
    h = jnp.maximum(x @ p["w1"] + p["b1"], 0.0)
    h = jnp.maximum(h @ p["w2"] + p["b2"], 0.0)
    h = jnp.maximum(h @ p["w3"] + p["b3"], 0.0)
    return h @ p["w4"] + p["b4"]


def reference_forward_bf16(x, p):
    """Pure-JAX reference following the same bf16-operand / f32-accumulate path."""
    bf = jnp.bfloat16
    h = x.astype(bf)
    h = jnp.maximum(jnp.dot(h, p["w1"].astype(bf),
                            preferred_element_type=jnp.float32) + p["b1"], 0.0).astype(bf)
    h = jnp.maximum(jnp.dot(h, p["w2"].astype(bf),
                            preferred_element_type=jnp.float32) + p["b2"], 0.0).astype(bf)
    h = jnp.maximum(jnp.dot(h, p["w3"].astype(bf),
                            preferred_element_type=jnp.float32) + p["b3"], 0.0).astype(bf)
    return jnp.dot(h, p["w4"].astype(bf),
                   preferred_element_type=jnp.float32) + p["b4"]


if __name__ == "__main__":
    key = jax.random.PRNGKey(0)
    kx, kp = jax.random.split(key)

    B, IN = 8, 8  # small batch, input_features=8 per module default
    x = jax.random.normal(kx, (B, IN), dtype=jnp.float32)
    params = make_params(kp)

    out = ann_model_forward(x, params)
    out = jax.block_until_ready(out)
    assert out.shape == (B, 2), out.shape

    # Correctness: compare against a precision-matched (bf16-operand) reference
    # tightly, and against the full f32 reference loosely (bf16 rounding).
    ref_bf = reference_forward_bf16(x, params)
    ref_f32 = reference_forward_f32(x, params)
    assert jnp.allclose(out, ref_bf, atol=1e-2, rtol=1e-2), "mismatch vs bf16-path reference"
    assert jnp.allclose(out, ref_f32, atol=5e-2, rtol=5e-2), "mismatch vs f32 reference"

    print("KERNEL_OK")
</pallas_src>

<mosaic_0001>
module attributes {stable_mosaic.version = 11 : i64} {
  func.func @mlp_kernel(%arg0: i32, %arg1: memref<16x8xbf16, #tpu.memory_space<vmem>>, %arg2: memref<8x256xbf16, #tpu.memory_space<vmem>>, %arg3: memref<1x256xf32, #tpu.memory_space<vmem>>, %arg4: memref<256x64xbf16, #tpu.memory_space<vmem>>, %arg5: memref<1x64xf32, #tpu.memory_space<vmem>>, %arg6: memref<64x64xbf16, #tpu.memory_space<vmem>>, %arg7: memref<1x64xf32, #tpu.memory_space<vmem>>, %arg8: memref<64x128xbf16, #tpu.memory_space<vmem>>, %arg9: memref<1x2xf32, #tpu.memory_space<vmem>>, %arg10: memref<16x2xf32, #tpu.memory_space<vmem>>) attributes {dimension_semantics = [#tpu.dimension_semantics<parallel>], iteration_bounds = array<i64: 1>, scalar_prefetch = 0 : i64, scratch_operands = 0 : i64, tpu.core_type = #tpu.core_type<tc>, window_params = [{transform_indices = @transform_0, window_bounds = array<i64: 16, 8>}, {pipeline_mode = #tpu.pipeline_mode<synchronous>, transform_indices = @transform_1, window_bounds = array<i64: 8, 256>}, {pipeline_mode = #tpu.pipeline_mode<synchronous>, transform_indices = @transform_2, window_bounds = array<i64: 1, 256>}, {pipeline_mode = #tpu.pipeline_mode<synchronous>, transform_indices = @transform_3, window_bounds = array<i64: 256, 64>}, {pipeline_mode = #tpu.pipeline_mode<synchronous>, transform_indices = @transform_4, window_bounds = array<i64: 1, 64>}, {pipeline_mode = #tpu.pipeline_mode<synchronous>, transform_indices = @transform_5, window_bounds = array<i64: 64, 64>}, {pipeline_mode = #tpu.pipeline_mode<synchronous>, transform_indices = @transform_6, window_bounds = array<i64: 1, 64>}, {pipeline_mode = #tpu.pipeline_mode<synchronous>, transform_indices = @transform_7, window_bounds = array<i64: 64, 128>}, {pipeline_mode = #tpu.pipeline_mode<synchronous>, transform_indices = @transform_8, window_bounds = array<i64: 1, 2>}, {transform_indices = @transform_9, window_bounds = array<i64: 16, 2>}]} {
    %c0 = arith.constant 0 : index
    %c0_0 = arith.constant 0 : index
    %0 = vector.load %arg1[%c0, %c0_0] : memref<16x8xbf16, #tpu.memory_space<vmem>>, vector<16x8xbf16>
    %c0_1 = arith.constant 0 : index
    %c0_2 = arith.constant 0 : index
    %1 = vector.load %arg2[%c0_1, %c0_2] : memref<8x256xbf16, #tpu.memory_space<vmem>>, vector<8x256xbf16>
    %cst = arith.constant dense<0.000000e+00> : vector<16x256xf32>
    %2 = tpu.matmul %0, %1, %cst {dimension_numbers = #tpu.dot_dimension_numbers<[1], [0], [0], [1], [0, 0, 1, 1], [], []>} : vector<16x8xbf16>, vector<8x256xbf16>, vector<16x256xf32> -> vector<16x256xf32>
    %c0_3 = arith.constant 0 : index
    %c0_4 = arith.constant 0 : index
    %3 = vector.load %arg3[%c0_3, %c0_4] : memref<1x256xf32, #tpu.memory_space<vmem>>, vector<1x256xf32>
    %4 = vector.broadcast %3 : vector<1x256xf32> to vector<16x256xf32>
    %5 = arith.addf %2, %4 : vector<16x256xf32>
    %cst_5 = arith.constant 0.000000e+00 : f32
    %6 = vector.broadcast %cst_5 : f32 to vector<16x256xf32>
    %7 = arith.maximumf %5, %6 : vector<16x256xf32>
    %8 = arith.truncf %7 : vector<16x256xf32> to vector<16x256xbf16>
    %c0_6 = arith.constant 0 : index
    %c0_7 = arith.constant 0 : index
    %9 = vector.load %arg4[%c0_6, %c0_7] : memref<256x64xbf16, #tpu.memory_space<vmem>>, vector<256x64xbf16>
    %cst_8 = arith.constant dense<0.000000e+00> : vector<16x64xf32>
    %10 = tpu.matmul %8, %9, %cst_8 {dimension_numbers = #tpu.dot_dimension_numbers<[1], [0], [0], [1], [0, 0, 1, 1], [], []>} : vector<16x256xbf16>, vector<256x64xbf16>, vector<16x64xf32> -> vector<16x64xf32>
    %c0_9 = arith.constant 0 : index
    %c0_10 = arith.constant 0 : index
    %11 = vector.load %arg5[%c0_9, %c0_10] : memref<1x64xf32, #tpu.memory_space<vmem>>, vector<1x64xf32>
    %12 = vector.broadcast %11 : vector<1x64xf32> to vector<16x64xf32>
    %13 = arith.addf %10, %12 : vector<16x64xf32>
    %cst_11 = arith.constant 0.000000e+00 : f32
    %14 = vector.broadcast %cst_11 : f32 to vector<16x64xf32>
    %15 = arith.maximumf %13, %14 : vector<16x64xf32>
    %16 = arith.truncf %15 : vector<16x64xf32> to vector<16x64xbf16>
    %c0_12 = arith.constant 0 : index
    %c0_13 = arith.constant 0 : index
    %17 = vector.load %arg6[%c0_12, %c0_13] : memref<64x64xbf16, #tpu.memory_space<vmem>>, vector<64x64xbf16>
    %cst_14 = arith.constant dense<0.000000e+00> : vector<16x64xf32>
    %18 = tpu.matmul %16, %17, %cst_14 {dimension_numbers = #tpu.dot_dimension_numbers<[1], [0], [0], [1], [0, 0, 1, 1], [], []>} : vector<16x64xbf16>, vector<64x64xbf16>, vector<16x64xf32> -> vector<16x64xf32>
    %c0_15 = arith.constant 0 : index
    %c0_16 = arith.constant 0 : index
    %19 = vector.load %arg7[%c0_15, %c0_16] : memref<1x64xf32, #tpu.memory_space<vmem>>, vector<1x64xf32>
    %20 = vector.broadcast %19 : vector<1x64xf32> to vector<16x64xf32>
    %21 = arith.addf %18, %20 : vector<16x64xf32>
    %cst_17 = arith.constant 0.000000e+00 : f32
    %22 = vector.broadcast %cst_17 : f32 to vector<16x64xf32>
    %23 = arith.maximumf %21, %22 : vector<16x64xf32>
    %24 = arith.truncf %23 : vector<16x64xf32> to vector<16x64xbf16>
    %c0_18 = arith.constant 0 : index
    %c0_19 = arith.constant 0 : index
    %25 = vector.load %arg8[%c0_18, %c0_19] : memref<64x128xbf16, #tpu.memory_space<vmem>>, vector<64x128xbf16>
    %cst_20 = arith.constant dense<0.000000e+00> : vector<16x128xf32>
    %26 = tpu.matmul %24, %25, %cst_20 {dimension_numbers = #tpu.dot_dimension_numbers<[1], [0], [0], [1], [0, 0, 1, 1], [], []>} : vector<16x64xbf16>, vector<64x128xbf16>, vector<16x128xf32> -> vector<16x128xf32>
    %27 = vector.extract_strided_slice %26 {offsets = [0, 0], sizes = [16, 2], strides = [1, 1]} : vector<16x128xf32> to vector<16x2xf32>
    %c0_21 = arith.constant 0 : index
    %c0_22 = arith.constant 0 : index
    %28 = vector.load %arg9[%c0_21, %c0_22] : memref<1x2xf32, #tpu.memory_space<vmem>>, vector<1x2xf32>
    %29 = vector.broadcast %28 : vector<1x2xf32> to vector<16x2xf32>
    %30 = arith.addf %27, %29 : vector<16x2xf32>
    %c0_23 = arith.constant 0 : index
    %c0_24 = arith.constant 0 : index
    %31 = vector.load %arg10[%c0_23, %c0_24] : memref<16x2xf32, #tpu.memory_space<vmem>>, vector<16x2xf32>
    tpu.vector_store %arg10[%c0_23, %c0_24], %30 {strides = array<i32>} : memref<16x2xf32, #tpu.memory_space<vmem>>, vector<16x2xf32>,
    return
  }
  func.func @transform_0(%arg0: i32) -> (i32, i32) {
    %c0_i32 = arith.constant 0 : i32
    %c0_i32_0 = arith.constant 0 : i32
    return %arg0, %c0_i32 : i32, i32
  }
  func.func @transform_1(%arg0: i32) -> (i32, i32) {
    %c0_i32 = arith.constant 0 : i32
    %c0_i32_0 = arith.constant 0 : i32
    %c0_i32_1 = arith.constant 0 : i32
    return %c0_i32, %c0_i32_0 : i32, i32
  }
  func.func @transform_2(%arg0: i32) -> (i32, i32) {
    %c0_i32 = arith.constant 0 : i32
    %c0_i32_0 = arith.constant 0 : i32
    %c0_i32_1 = arith.constant 0 : i32
    return %c0_i32, %c0_i32_0 : i32, i32
  }
  func.func @transform_3(%arg0: i32) -> (i32, i32) {
    %c0_i32 = arith.constant 0 : i32
    %c0_i32_0 = arith.constant 0 : i32
    %c0_i32_1 = arith.constant 0 : i32
    return %c0_i32, %c0_i32_0 : i32, i32
  }
  func.func @transform_4(%arg0: i32) -> (i32, i32) {
    %c0_i32 = arith.constant 0 : i32
    %c0_i32_0 = arith.constant 0 : i32
    %c0_i32_1 = arith.constant 0 : i32
    return %c0_i32, %c0_i32_0 : i32, i32
  }
  func.func @transform_5(%arg0: i32) -> (i32, i32) {
    %c0_i32 = arith.constant 0 : i32
    %c0_i32_0 = arith.constant 0 : i32
    %c0_i32_1 = arith.constant 0 : i32
    return %c0_i32, %c0_i32_0 : i32, i32
  }
  func.func @transform_6(%arg0: i32) -> (i32, i32) {
    %c0_i32 = arith.constant 0 : i32
    %c0_i32_0 = arith.constant 0 : i32
    %c0_i32_1 = arith.constant 0 : i32
    return %c0_i32, %c0_i32_0 : i32, i32
  }
  func.func @transform_7(%arg0: i32) -> (i32, i32) {
    %c0_i32 = arith.constant 0 : i32
    %c0_i32_0 = arith.constant 0 : i32
    %c0_i32_1 = arith.constant 0 : i32
    return %c0_i32, %c0_i32_0 : i32, i32
  }
  func.func @transform_8(%arg0: i32) -> (i32, i32) {
    %c0_i32 = arith.constant 0 : i32
    %c0_i32_0 = arith.constant 0 : i32
    %c0_i32_1 = arith.constant 0 : i32
    return %c0_i32, %c0_i32_0 : i32, i32
  }
  func.func @transform_9(%arg0: i32) -> (i32, i32) {
    %c0_i32 = arith.constant 0 : i32
    %c0_i32_0 = arith.constant 0 : i32
    return %arg0, %c0_i32 : i32, i32
  }
}

</mosaic_0001>

<bundles_post_ra>
// kernel: tpu_custom_call.1
= control target key start
LH: loop header
LB: loop body
LE: loop exit
PB: predicated region body
PF: predicated region fallthrough
CT: control target
= control target key end

     0   :  { %vm62_vm0 = vcmask 1043456   ;;  %v596_v1 = vmov 0   ;;  %vm58_vm1 = vcmask 64512   ;;  %v597_v22 = vmov 0.0   ;;  %s759_s1 = inlined_call_operand.vmem [shape: bf16[8,256], index: 1, kind: input, shape index: {}]   ;;  %s760_s0 = inlined_call_operand.vmem [shape: bf16[16,8], index: 0, kind: input, shape index: {}]   ;;  %s761_s3 = inlined_call_operand.vmem [shape: bf16[256,64], index: 3, kind: input, shape index: {}]   ;;  %s762_s5 = inlined_call_operand.vmem [shape: bf16[64,64], index: 5, kind: input, shape index: {}]   ;;  %s763_s2 = inlined_call_operand.vmem [shape: f32[1,256], index: 2, kind: input, shape index: {}]   ;;  %s764_s7 = inlined_call_operand.vmem [shape: bf16[64,128], index: 7, kind: input, shape index: {}]   ;;  %s765_s4 = inlined_call_operand.vmem [shape: f32[1,64], index: 4, kind: input, shape index: {}]   ;;  %s766_s6 = inlined_call_operand.vmem [shape: f32[1,64], index: 6, kind: input, shape index: {}]   ;;  %s767_s8 = inlined_call_operand.vmem [shape: f32[1,2], index: 8, kind: input, shape index: {}]   ;;  %s768_s9 = inlined_call_operand.vmem [shape: f32[16,2], index: 9, kind: output, shape index: {}]  }
   0x1   :  { %v35_v0 = vld [vmem:[%s759_s1] sm:$0xff]  ;;  %101 = vmatprep.mubr.bf16.mxu0 %v596_v1  ;;  %v574_v8 = vld [vmem:[%s761_s3 + $0x48] sm:$0xff]   ;;  %v576_v10 = vld [vmem:[%s761_s3 + $0x50] sm:$0xff]   ;;  %v38_v24 = vlaneseq  ;;  %vm598_vm2 = vmmov 0   ;;  %vm336_vm3 = vcmask 523264   ;;  %vm469_vm4 = vcmask 15360  }
   0x2   :  { %v478_v2 = vcombine.high %v35_v0, %v35_v0  ;;  %v477_v3 = vcombine.low %v35_v0, %v35_v0  ;;  %v571_v4 = vld [vmem:[%s760_s0] sm:$0xff]   ;;  %v575_v9 = vld [vmem:[%s761_s3 + $0x8] sm:$0xff]   ;;  %v577_v11 = vld [vmem:[%s761_s3 + $0x10] sm:$0xff]  }
   0x3   :  { %v572_v5 = vld [vmem:[%s761_s3 + $0x40] sm:$0xff]   ;;  %v578_v12 = vld [vmem:[%s761_s3 + $0x58] sm:$0xff]   ;;  %v582_v16 = vld [vmem:[%s761_s3 + $0x68] sm:$0xff]   ;;  %v39_v25 = vshrl.u32 %v38_v24, 7 }
   0x4   :  { %479 = vmatprep.subr.msk.bf16.mxu0 %vm62_vm0, %v478_v2  ;;  %v64_v6 = vsel %vm62_vm0, %v477_v3, 0  ;;  %v573_v7 = vld [vmem:[%s761_s3] sm:$0xff]   ;;  %510 = vmatprep.subr.bf16.mxu1 %v572_v5  ;;  %v579_v13 = vld [vmem:[%s761_s3 + $0x18] sm:$0xff]   ;;  %v583_v17 = vld [vmem:[%s761_s3 + $0x28] sm:$0xff]  }
   0x5   :  { %70 = vmatpush1.bf16.msra.mxu0 %v64_v6  ;;  %511 = vmatpush3.bf16.msra.mxu1 %v573_v7  ;;  %v580_v14 = vld [vmem:[%s761_s3 + $0x60] sm:$0xff]   ;;  %v584_v18 = vld [vmem:[%s761_s3 + $0x70] sm:$0xff]   ;;  %v586_v20 = vld [vmem:[%s761_s3 + $0x78] sm:$0xff]   ;;  %v40_v26 = vsub.s32 0, %v39_v25  ;;  %v44_v28 = vsub.s32 1, %v39_v25 }
   0x6   :  { %512 = vmatprep.subr.bf16.mxu1 %v574_v8  ;;  %v581_v15 = vld [vmem:[%s761_s3 + $0x20] sm:$0xff]   ;;  %v585_v19 = vld [vmem:[%s761_s3 + $0x30] sm:$0xff]   ;;  %v587_v21 = vld [vmem:[%s761_s3 + $0x38] sm:$0xff]   ;;  %542 = vmatprep.subr.bf16.mxu0 %v597_v22 }
   0x7   :  { %v588_v23 = vld [vmem:[%s762_s5] sm:$0xff]   ;;  %v589_v45 = vld [vmem:[%s762_s5 + $0x8] sm:$0xff]   ;;  %v590_v46 = vld [vmem:[%s762_s5 + $0x10] sm:$0xff]  }
   0x8   :  { %480 = vmatmul.mubr.msk.bf16.vlgmr.msra.gmra.mrb[0].mxu0 %vm58_vm1, %v571_v4  ;;  %v36_v27 = vld [vmem:[%s763_s2] sm:$0x3]  ;;  %v591_v47 = vld [vmem:[%s762_s5 + $0x18] sm:$0xff]   ;;  %v593_v61 = vld [vmem:[%s764_s7 + $0x8] sm:$0xff]  }
   0x9   :  { %513 = vmatpush3.bf16.msra.mxu1 %v575_v9  ;;  %543 = vmatpush3.bf16.msra.mxu0 %v588_v23  ;;  %v41_v29 = vrot.slane %v36_v27, %v40_v26  ;;  %v45_v30 = vrot.slane %v36_v27, %v44_v28  ;;  %v481_v49 = vld [vmem:[%s765_s4] ss:$0 sm:$0xff]  ;;  %v594_v62 = vld [vmem:[%s764_s7 + $0x10] sm:$0xff]   ;;  %v595_v63 = vld [vmem:[%s764_s7 + $0x18] sm:$0xff]  }
   0xa   :  { %514 = vmatprep.subr.bf16.mxu1 %v576_v10  ;;  %544 = vmatprep.subr.bf16.mxu0 %v597_v22  ;;  %v592_v59 = vld [vmem:[%s764_s7] sm:$0xff]  }
   0xb   :  { %550 = vmatprep.mubr.msk.bf16.mxu0 %vm598_vm2, %v597_v22  ;;  %v498_v0 = vld [vmem:[%s766_s6] ss:$0 sm:$0xff] }
   0xc   :  { %v509_v10 = vld [vmem:[%s767_s8] ss:$0 sm:$0xff] }
   0xd   :  { %515 = vmatpush3.bf16.msra.mxu1 %v577_v11  ;;  %545 = vmatpush3.bf16.msra.mxu0 %v589_v45 }
   0xe   :  { %516 = vmatprep.subr.bf16.mxu1 %v578_v12  ;;  %546 = vmatprep.subr.bf16.mxu0 %v597_v22 }
  0x11   :  { %517 = vmatpush3.bf16.msra.mxu1 %v579_v13  ;;  %547 = vmatpush3.bf16.msra.mxu0 %v590_v46 }
  0x12   :  { %518 = vmatprep.subr.bf16.mxu1 %v580_v14  ;;  %548 = vmatprep.subr.bf16.mxu0 %v597_v22 }
  0x15   :  { %519 = vmatpush3.bf16.msra.mxu1 %v581_v15  ;;  %549 = vmatpush3.bf16.msra.mxu0 %v591_v47 }
  0x16   :  { %520 = vmatprep.subr.bf16.mxu1 %v582_v16  ;;  %554 = vmatprep.subr.bf16.mxu0 %v597_v22 }
  0x19   :  { %521 = vmatpush3.bf16.msra.mxu1 %v583_v17 }
  0x1a   :  { %522 = vmatprep.subr.bf16.mxu1 %v584_v18 }
  0x1d   :  { %523 = vmatpush3.bf16.msra.mxu1 %v585_v19 }
  0x1e   :  { %524 = vmatprep.subr.bf16.mxu1 %v586_v20 }
  0x21   :  { %525 = vmatpush3.bf16.msra.mxu1 %v587_v21 }
  0xdb   :  { %v103_v31 = vpop.f32.mrb[0].mxu0 }
  0xdc   :  { %v104_v32 = vadd.f32 %v103_v31, %v41_v29  ;;  %v105_v33 = vpop.f32.mrb[1].mxu0 }
  0xdd   :  { %v106_v34 = vadd.f32 %v105_v33, %v45_v30  ;;  %v107_v35 = vpop.f32.mrb[2].mxu0 }
  0xde   :  { %v108_v36 = vadd.f32 %v107_v35, %v41_v29  ;;  %v109_v37 = vpop.f32.mrb[3].mxu0  ;;  %v112_v39 = vmax.f32 %v104_v32, 0.0 }
  0xdf   :  { %v110_v38 = vadd.f32 %v109_v37, %v45_v30  ;;  %v113_v41 = vmax.f32 %v106_v34, 0.0 }
  0xe0   :  { %v114_v40 = vmax.f32 %v108_v36, 0.0 }
  0xe1   :  { %v115_v42 = vmax.f32 %v110_v38, 0.0 }
  0xe2   :  { %v116_v43 = vpack.c.bf16 %v114_v40, %v112_v39 }
  0xe3   :  { %v117_v44 = vpack.c.bf16 %v115_v42, %v113_v41 }
  0xe5   :  { %285 = vmatprep.mubr.bf16.mxu1 %v117_v44 }
  0xe6   :  { %286 = vmatmul.mubr.bf16.vlgmr.msra.gmra.mrb[0].mxu1 %v116_v43 }
 0x1b9   :  { %v526_v48 = vpop.f32.mrb[0].mxu1 }
 0x1ba   :  { %v527_v50 = vpop.f32.mrb[1].mxu1 }
 0x1bb   :  { %v528_v51 = vadd.f32 %v527_v50, %v526_v48  ;;  %v529_v52 = vpop.f32.mrb[2].mxu1 }
 0x1bc   :  { %v530_v53 = vpop.f32.mrb[3].mxu1 }
 0x1bd   :  { %v288_v54 = vadd.f32 %v528_v51, %v481_v49  ;;  %v531_v55 = vadd.f32 %v530_v53, %v529_v52 }
 0x1bf   :  { %v291_v56 = vadd.f32 %v531_v55, %v481_v49  ;;  %v294_v57 = vmax.f32 %v288_v54, 0.0 }
 0x1c1   :  { %v295_v58 = vmax.f32 %v291_v56, 0.0 }
 0x1c3   :  { %v296_v60 = vpack.c.bf16 %v295_v58, %v294_v57 }
 0x1c5   :  { %551 = vmatmul.mubr.msk.bf16.vlgmr.msra.gmra.mrb[4].mxu0 %vm336_vm3, %v296_v60 }
 0x1c6   :  { %555 = vmatpush3.bf16.msra.mxu0 %v592_v59  ;;  %562 = vmatprep.mubr.msk.bf16.mxu0 %vm598_vm2, %v597_v22 }
 0x1c7   :  { %556 = vmatprep.subr.bf16.mxu0 %v597_v22 }
 0x1ca   :  { %557 = vmatpush3.bf16.msra.mxu0 %v593_v61 }
 0x1cb   :  { %558 = vmatprep.subr.bf16.mxu0 %v597_v22 }
 0x1ce   :  { %559 = vmatpush3.bf16.msra.mxu0 %v594_v62 }
 0x1cf   :  { %560 = vmatprep.subr.bf16.mxu0 %v597_v22 }
 0x1d2   :  { %561 = vmatpush3.bf16.msra.mxu0 %v595_v63 }
 0x298   :  { %v374_v1 = vpop.f32.mrb[4].mxu0 }
 0x299   :  { %v375_v2 = vadd.f32 %v498_v0, %v374_v1  ;;  %v552_v3 = vpop.f32.mrb[5].mxu0 }
 0x29a   :  { %v377_v4 = vpop.f32.mrb[6].mxu0 }
 0x29b   :  { %v378_v5 = vadd.f32 %v498_v0, %v377_v4  ;;  %v553_v6 = vpop.f32.mrb[7].mxu0  ;;  %v381_v7 = vmax.f32 %v375_v2, 0.0 }
 0x29d   :  { %v382_v8 = vmax.f32 %v378_v5, 0.0 }
 0x29f   :  { %v383_v9 = vpack.c.bf16 %v382_v8, %v381_v7 }
 0x2a1   :  { %563 = vmatmul.mubr.msk.bf16.vlgmr.msra.gmra.mrb[8].mxu0 %vm336_vm3, %v383_v9 }
 0x374   :  { %v453_v11 = vpop.f32.mrb[8].mxu0 }
 0x375   :  { %v467_v12 = vadd.f32 %v509_v10, %v453_v11  ;;  %v564_v13 = vpop.f32.mrb[9].mxu0 }
 0x376   :  { %v456_v14 = vpop.f32.mrb[10].mxu0 }
 0x377   :  { %470 = vst.msk [vmem:[%s768_s9] sm:$0xff] %vm469_vm4, %v467_v12  ;;  %v468_v15 = vadd.f32 %v509_v10, %v456_v14  ;;  %v565_v16 = vpop.f32.mrb[11].mxu0 }
 0x379   :  { %471 = vst.msk [vmem:[%s768_s9 + $0x8] sm:$0xff] %vm469_vm4, %v468_v15 }

</bundles_post_ra>
